<compile_context>
chip_gen: v6e
topology: v6e:2x2x1
jax: 0.10.0
libtpu: 0.0.40
codegen_flags: <defaults>
</compile_context>

<pallas_src>
import functools

import jax
import jax.numpy as jnp
from jax.experimental import pallas as pl
from jax.experimental.pallas import tpu as pltpu


def _sigmoid(z):
    # exp on the EUP + approximate reciprocal on the EUP (frees VALU slots).
    return pl.reciprocal(1.0 + jnp.exp(-z), approx=True)


def _ffnn_kernel(xt_ref, w1_ref, b1_ref, w2_ref, b2_ref, out_ref):
    # xt_ref : (D, TB)  f32 tile of x^T   (batch on the lane axis)
    # w1_ref : (Hp, D)  bf16, VMEM-resident (PyTorch (out,in) layout, H padded)
    # b1_ref : (Hp, 1)  f32, VMEM-resident
    # w2_ref : (Hp, 1)  f32, VMEM-resident
    # b2_ref : (1, 1)   f32 scalar in SMEM
    # out_ref: (1, TB)  f32 lane-dense output row
    xb = xt_ref[...].astype(jnp.bfloat16)                       # (D, TB)
    z1 = jnp.dot(w1_ref[...], xb,
                 preferred_element_type=jnp.float32)            # (Hp, TB) f32
    z1 = z1 + b1_ref[...]                                       # + (Hp, 1) broadcast
    a1 = _sigmoid(z1)                                           # (Hp, TB) f32

    # Second linear has a single output feature -> VPU mul + sublane reduce
    # (an MXU matmul here would use 1 of 128/256 output columns).
    z2 = jnp.sum(a1 * w2_ref[...], axis=0, keepdims=True)       # (1, TB)
    z2 = z2 + b2_ref[0, 0]
    out_ref[...] = _sigmoid(z2).astype(out_ref.dtype)


def _round_up(n, m):
    return ((n + m - 1) // m) * m


@functools.partial(jax.jit, static_argnames=("block_b",))
def ffnn_forward(x, w1, b1, w2, b2, *, block_b=128):
    """Fused FFNN forward pass (matches PyTorch FFNN.forward).

    x : (B, D) float32
    w1: (H, D) float32   (nn.Linear weight layout: (out_features, in_features))
    b1: (H,)   float32
    w2: (1, H) float32
    b2: (1,)   float32
    returns (B, 1) float32

    block_b must be a multiple of 128; use 512-1024 for large B (stays well
    under the 32 MiB scoped / 64 MiB v7x VMEM even with double-buffering).
    """
    assert block_b % 128 == 0
    B, D = x.shape
    H = w1.shape[0]

    H_pad = _round_up(H, 128)               # full lane / MXU width for hidden dim
    B_pad = _round_up(B, block_b)
    grid = (B_pad // block_b,)

    # One-time layout plumbing outside the kernel: batch -> lane axis,
    # hidden dim zero-padded, first-layer weight pre-cast to bf16.
    x_t = jnp.zeros((D, B_pad), jnp.float32).at[:, :B].set(x.T)
    w1_p = jnp.zeros((H_pad, D), jnp.bfloat16).at[:H, :].set(w1.astype(jnp.bfloat16))
    b1_p = jnp.zeros((H_pad, 1), jnp.float32).at[:H, 0].set(b1.astype(jnp.float32))
    w2_p = jnp.zeros((H_pad, 1), jnp.float32).at[:H, 0].set(
        w2.reshape(-1).astype(jnp.float32))
    b2_p = jnp.asarray(b2, jnp.float32).reshape(1, 1)

    cost = pl.CostEstimate(
        flops=2 * B_pad * D * H_pad + 3 * B_pad * H_pad,
        transcendentals=2 * B_pad * (H_pad + 1),
        bytes_accessed=4 * B_pad * D + 2 * H_pad * D + 8 * H_pad + 4 * B_pad,
    )

    out_row = pl.pallas_call(
        _ffnn_kernel,
        out_shape=jax.ShapeDtypeStruct((1, B_pad), jnp.float32),
        grid=grid,
        in_specs=[
            pl.BlockSpec((D, block_b), lambda i: (0, i)),        # x^T batch tile
            pl.BlockSpec((H_pad, D), lambda i: (0, 0)),          # W1 (resident)
            pl.BlockSpec((H_pad, 1), lambda i: (0, 0)),          # b1 (resident)
            pl.BlockSpec((H_pad, 1), lambda i: (0, 0)),          # w2 (resident)
            pl.BlockSpec(memory_space=pltpu.MemorySpace.SMEM),   # b2 scalar
        ],
        out_specs=pl.BlockSpec((1, block_b), lambda i: (0, i)),  # lane-dense row
        compiler_params=pltpu.CompilerParams(
            dimension_semantics=("parallel",),
        ),
        cost_estimate=cost,
    )(x_t, w1_p, b1_p, w2_p, b2_p)

    return out_row[0, :B].reshape(B, 1)


def _reference(x, w1, b1, w2, b2):
    z1 = x @ w1.T + b1
    a1 = jax.nn.sigmoid(z1)
    z2 = a1 @ w2.T + b2
    return jax.nn.sigmoid(z2)


if __name__ == "__main__":
    # Small shapes consistent with FFNN(dims, hidden_nodes)
    batch, dims, hidden = 8, 32, 64

    key = jax.random.PRNGKey(0)
    kx, kw1, kb1, kw2, kb2 = jax.random.split(key, 5)

    x = jax.random.normal(kx, (batch, dims), dtype=jnp.float32)

    # Deterministic init mimicking nn.Linear's uniform(-1/sqrt(fan_in), +).
    # Weights in PyTorch-native (out_features, in_features) layout.
    bound1 = 1.0 / jnp.sqrt(dims)
    w1 = jax.random.uniform(kw1, (hidden, dims), jnp.float32, -bound1, bound1)
    b1 = jax.random.uniform(kb1, (hidden,), jnp.float32, -bound1, bound1)
    bound2 = 1.0 / jnp.sqrt(hidden)
    w2 = jax.random.uniform(kw2, (1, hidden), jnp.float32, -bound2, bound2)
    b2 = jax.random.uniform(kb2, (1,), jnp.float32, -bound2, bound2)

    out = ffnn_forward(x, w1, b1, w2, b2)
    jax.block_until_ready(out)

    ref = _reference(x, w1, b1, w2, b2)
    assert out.shape == (batch, 1)
    # bf16 matmul inputs + approx reciprocal -> loosened tolerance.
    assert jnp.allclose(out, ref, atol=1e-2, rtol=1e-2), "mismatch vs reference"

    print("KERNEL_OK")
</pallas_src>

<mosaic_0001>
module attributes {stable_mosaic.version = 11 : i64} {
  func.func @_ffnn_kernel(%arg0: i32, %arg1: memref<32x128xf32, #tpu.memory_space<vmem>>, %arg2: memref<128x32xbf16, #tpu.memory_space<vmem>>, %arg3: memref<128x1xf32, #tpu.memory_space<vmem>>, %arg4: memref<128x1xf32, #tpu.memory_space<vmem>>, %arg5: memref<1x1xf32, #tpu.memory_space<smem>>, %arg6: memref<1x128xf32, #tpu.memory_space<vmem>>) attributes {dimension_semantics = [#tpu.dimension_semantics<parallel>], iteration_bounds = array<i64: 1>, scalar_prefetch = 0 : i64, scratch_operands = 0 : i64, tpu.core_type = #tpu.core_type<tc>, window_params = [{transform_indices = @transform_0, window_bounds = array<i64: 32, 128>}, {pipeline_mode = #tpu.pipeline_mode<synchronous>, transform_indices = @transform_1, window_bounds = array<i64: 128, 32>}, {pipeline_mode = #tpu.pipeline_mode<synchronous>, transform_indices = @transform_2, window_bounds = array<i64: 128, 1>}, {pipeline_mode = #tpu.pipeline_mode<synchronous>, transform_indices = @transform_3, window_bounds = array<i64: 128, 1>}, {transform_indices = @transform_4, window_bounds = array<i64: 1, 1>}, {transform_indices = @transform_5, window_bounds = array<i64: 1, 128>}]} {
    %c0 = arith.constant 0 : index
    %c0_0 = arith.constant 0 : index
    %0 = vector.load %arg1[%c0, %c0_0] : memref<32x128xf32, #tpu.memory_space<vmem>>, vector<32x128xf32>
    %1 = arith.truncf %0 : vector<32x128xf32> to vector<32x128xbf16>
    %c0_1 = arith.constant 0 : index
    %c0_2 = arith.constant 0 : index
    %2 = vector.load %arg2[%c0_1, %c0_2] : memref<128x32xbf16, #tpu.memory_space<vmem>>, vector<128x32xbf16>
    %cst = arith.constant dense<0.000000e+00> : vector<128x128xf32>
    %3 = tpu.matmul %2, %1, %cst {dimension_numbers = #tpu.dot_dimension_numbers<[1], [0], [0], [1], [0, 0, 1, 1], [], []>} : vector<128x32xbf16>, vector<32x128xbf16>, vector<128x128xf32> -> vector<128x128xf32>
    %c0_3 = arith.constant 0 : index
    %c0_4 = arith.constant 0 : index
    %4 = vector.load %arg3[%c0_3, %c0_4] : memref<128x1xf32, #tpu.memory_space<vmem>>, vector<128x1xf32>
    %5 = vector.broadcast %4 : vector<128x1xf32> to vector<128x128xf32>
    %6 = arith.addf %3, %5 : vector<128x128xf32>
    %cst_5 = arith.constant 0.000000e+00 : f32
    %7 = vector.broadcast %cst_5 : f32 to vector<128x128xf32>
    %8 = arith.subf %7, %6 : vector<128x128xf32>
    %9 = math.exp %8 : vector<128x128xf32>
    %cst_6 = arith.constant 1.000000e+00 : f32
    %10 = vector.broadcast %cst_6 : f32 to vector<128x128xf32>
    %11 = arith.addf %10, %9 : vector<128x128xf32>
    %12 = tpu.reciprocal %11 {approx = true} : vector<128x128xf32> -> vector<128x128xf32>
    %c0_7 = arith.constant 0 : index
    %c0_8 = arith.constant 0 : index
    %13 = vector.load %arg4[%c0_7, %c0_8] : memref<128x1xf32, #tpu.memory_space<vmem>>, vector<128x1xf32>
    %14 = vector.broadcast %13 : vector<128x1xf32> to vector<128x128xf32>
    %15 = arith.mulf %12, %14 : vector<128x128xf32>
    %cst_9 = arith.constant dense<0.000000e+00> : vector<128xf32>
    %16 = vector.multi_reduction <add>, %15, %cst_9 [0] : vector<128x128xf32> to vector<128xf32>
    %17 = vector.shape_cast %16 : vector<128xf32> to vector<1x128xf32>
    %c0_10 = arith.constant 0 : index
    %c0_11 = arith.constant 0 : index
    %18 = memref.load %arg5[%c0_10, %c0_11] : memref<1x1xf32, #tpu.memory_space<smem>>
    %19 = vector.broadcast %18 : f32 to vector<1x128xf32>
    %20 = arith.addf %17, %19 : vector<1x128xf32>
    %cst_12 = arith.constant 0.000000e+00 : f32
    %21 = vector.broadcast %cst_12 : f32 to vector<1x128xf32>
    %22 = arith.subf %21, %20 : vector<1x128xf32>
    %23 = math.exp %22 : vector<1x128xf32>
    %cst_13 = arith.constant 1.000000e+00 : f32
    %24 = vector.broadcast %cst_13 : f32 to vector<1x128xf32>
    %25 = arith.addf %24, %23 : vector<1x128xf32>
    %26 = tpu.reciprocal %25 {approx = true} : vector<1x128xf32> -> vector<1x128xf32>
    %c0_14 = arith.constant 0 : index
    %c0_15 = arith.constant 0 : index
    %27 = vector.load %arg6[%c0_14, %c0_15] : memref<1x128xf32, #tpu.memory_space<vmem>>, vector<1x128xf32>
    tpu.vector_store %arg6[%c0_14, %c0_15], %26 {strides = array<i32>} : memref<1x128xf32, #tpu.memory_space<vmem>>, vector<1x128xf32>,
    return
  }
  func.func @transform_0(%arg0: i32) -> (i32, i32) {
    %c0_i32 = arith.constant 0 : i32
    %c0_i32_0 = arith.constant 0 : i32
    return %c0_i32, %arg0 : i32, i32
  }
  func.func @transform_1(%arg0: i32) -> (i32, i32) {
    %c0_i32 = arith.constant 0 : i32
    %c0_i32_0 = arith.constant 0 : i32
    %c0_i32_1 = arith.constant 0 : i32
    return %c0_i32, %c0_i32_0 : i32, i32
  }
  func.func @transform_2(%arg0: i32) -> (i32, i32) {
    %c0_i32 = arith.constant 0 : i32
    %c0_i32_0 = arith.constant 0 : i32
    %c0_i32_1 = arith.constant 0 : i32
    return %c0_i32, %c0_i32_0 : i32, i32
  }
  func.func @transform_3(%arg0: i32) -> (i32, i32) {
    %c0_i32 = arith.constant 0 : i32
    %c0_i32_0 = arith.constant 0 : i32
    %c0_i32_1 = arith.constant 0 : i32
    return %c0_i32, %c0_i32_0 : i32, i32
  }
  func.func @transform_4(%arg0: i32) -> (i32, i32) {
    %c0_i32 = arith.constant 0 : i32
    %c0_i32_0 = arith.constant 0 : i32
    %c0_i32_1 = arith.constant 0 : i32
    return %c0_i32, %c0_i32_0 : i32, i32
  }
  func.func @transform_5(%arg0: i32) -> (i32, i32) {
    %c0_i32 = arith.constant 0 : i32
    %c0_i32_0 = arith.constant 0 : i32
    return %c0_i32, %arg0 : i32, i32
  }
}

</mosaic_0001>

<bundles_post_ra>
// kernel: ffnn_forward.1
= control target key start
LH: loop header
LB: loop body
LE: loop exit
PB: predicated region body
PF: predicated region fallthrough
CT: control target
= control target key end

     0   :  { %v657_v3 = vmov 0   ;;  %vm180_vm0 = vcmask 261120   ;;  %s834_s0 = inlined_call_operand.vmem [shape: f32[32,128], index: 0, kind: input, shape index: {}]   ;;  %s835_s1 = inlined_call_operand.vmem [shape: bf16[128,32], index: 1, kind: input, shape index: {}]   ;;  %s836_s2 = inlined_call_operand.vmem [shape: f32[128,1], index: 2, kind: input, shape index: {}]   ;;  %s837_s3 = inlined_call_operand.vmem [shape: f32[128,1], index: 3, kind: input, shape index: {}]   ;;  %s838_s4 = inlined_call_operand.<no memory space> [shape: f32[1,1], index: 4, kind: input, shape index: {}]   ;;  %s839_s5 = inlined_call_operand.vmem [shape: f32[1,128], index: 5, kind: output, shape index: {}]  }
   0x1   :  { %v24_v0 = vld [vmem:[%s834_s0 + $0x10] sm:$0xff]  ;;  %v25_v1 = vld [vmem:[%s834_s0 + $0x18] sm:$0xff]  ;;  %v22_v2 = vld [vmem:[%s834_s0] sm:$0xff]  ;;  %579 = vset.pattern.permute.xlu0 %v657_v3  ;;  %580 = vset.pattern.permute.xlu1 %v657_v3 }
   0x2   :  { %v27_v4 = vpack.c.bf16 %v25_v1, %v24_v0  ;;  %v23_v5 = vld [vmem:[%s834_s0 + $0x8] sm:$0xff]  ;;  %v581_v7 = vld [vmem:[%s835_s1] sm:$0xff]   ;;  %v585_v11 = vld [vmem:[%s835_s1 + $0x10] sm:$0xff]  }
   0x3   :  { %v26_v6 = vpack.c.bf16 %v23_v5, %v22_v2  ;;  %v582_v8 = vld [vmem:[%s835_s1 + $0x20] sm:$0xff]   ;;  %v583_v9 = vld [vmem:[%s835_s1 + $0x8] sm:$0xff]   ;;  %558 = vmatprep.mubr.msk.bf16.mxu0 %vm180_vm0, %v581_v7  ;;  %v586_v12 = vld [vmem:[%s835_s1 + $0x30] sm:$0xff]  }
   0x4   :  { %554 = vmatprep.subr.bf16.mxu0 %v27_v4  ;;  %574 = vmatprep.subr.bf16.mxu1 %v27_v4  ;;  %v584_v10 = vld [vmem:[%s835_s1 + $0x28] sm:$0xff]   ;;  %v44_v13 = vld [vmem:[%s836_s2] sm:$0xff]  ;;  %v46_v14 = vld [vmem:[%s836_s2 + $0x10] sm:$0xff] }
   0x5   :  { %555 = vmatpush3.bf16.msra.mxu0 %v27_v4  ;;  %576 = vmatpush3.bf16.msra.mxu1 %v27_v4  ;;  %v45_v15 = vld [vmem:[%s836_s2 + $0x8] sm:$0xff]  ;;  %v47_v16 = vld [vmem:[%s836_s2 + $0x18] sm:$0xff]  ;;  %v48_v19 = vld [vmem:[%s836_s2 + $0x20] sm:$0xff] }
   0x6   :  { %556 = vmatprep.subr.bf16.mxu0 %v26_v6  ;;  %575 = vmatprep.subr.bf16.mxu1 %v26_v6  ;;  %v587_v17 = vld [vmem:[%s835_s1 + $0x18] sm:$0xff]   ;;  %v49_v20 = vld [vmem:[%s836_s2 + $0x28] sm:$0xff]  ;;  %v50_v21 = vld [vmem:[%s836_s2 + $0x30] sm:$0xff] }
   0x7   :  { %566 = vmatprep.mubr.msk.bf16.mxu1 %vm180_vm0, %v582_v8  ;;  %62 = vperm.xlu0 %579, %v44_v13   ;;  %v588_v18 = vld [vmem:[%s835_s1 + $0x38] sm:$0xff]   ;;  %v52_v23 = vld [vmem:[%s836_s2 + $0x40] sm:$0xff]  ;;  %v53_v24 = vld [vmem:[%s836_s2 + $0x48] sm:$0xff] }
   0x8   :  { %72 = vperm.xlu1 %580, %v46_v14   ;;  %v51_v22 = vld [vmem:[%s836_s2 + $0x38] sm:$0xff]  ;;  %v54_v25 = vld [vmem:[%s836_s2 + $0x50] sm:$0xff]  ;;  %v56_v27 = vld [vmem:[%s836_s2 + $0x60] sm:$0xff] }
   0x9   :  { %557 = vmatpush3.bf16.msra.mxu0 %v26_v6  ;;  %577 = vmatpush3.bf16.msra.mxu1 %v26_v6  ;;  %v55_v26 = vld [vmem:[%s836_s2 + $0x58] sm:$0xff]  ;;  %v57_v28 = vld [vmem:[%s836_s2 + $0x68] sm:$0xff]  ;;  %v58_v29 = vld [vmem:[%s836_s2 + $0x70] sm:$0xff] }
   0xa   :  { %v59_v30 = vld [vmem:[%s836_s2 + $0x78] sm:$0xff]  ;;  %v382_v31 = vld [vmem:[%s837_s3] sm:$0xff]  ;;  %v383_v32 = vld [vmem:[%s837_s3 + $0x8] sm:$0xff] }
   0xb   :  { %67 = vperm.xlu0 %579, %v45_v15   ;;  %v384_v33 = vld [vmem:[%s837_s3 + $0x10] sm:$0xff]  ;;  %v385_v34 = vld [vmem:[%s837_s3 + $0x18] sm:$0xff]  ;;  %v386_v35 = vld [vmem:[%s837_s3 + $0x20] sm:$0xff] }
   0xc   :  { %559 = vmatmul.mubr.msk.bf16.vlgmr.msra.gmra.mxu0 %vm180_vm0, %v583_v9  ;;  %567 = vmatmul.mubr.msk.bf16.vlgmr.msra.gmra.mxu1 %vm180_vm0, %v584_v10  ;;  %v387_v36 = vld [vmem:[%s837_s3 + $0x28] sm:$0xff]  ;;  %v388_v37 = vld [vmem:[%s837_s3 + $0x30] sm:$0xff]  ;;  %v389_v38 = vld [vmem:[%s837_s3 + $0x38] sm:$0xff] }
   0xd   :  { %562 = vmatprep.mubr.msk.bf16.mxu0 %vm180_vm0, %v585_v11  ;;  %570 = vmatprep.mubr.msk.bf16.mxu1 %vm180_vm0, %v586_v12  ;;  %v390_v39 = vld [vmem:[%s837_s3 + $0x40] sm:$0xff]  ;;  %v391_v40 = vld [vmem:[%s837_s3 + $0x48] sm:$0xff]  ;;  %v392_v41 = vld [vmem:[%s837_s3 + $0x50] sm:$0xff] }
   0xe   :  { %77 = vperm.xlu1 %580, %v47_v16   ;;  %v393_v42 = vld [vmem:[%s837_s3 + $0x58] sm:$0xff]  ;;  %v394_v43 = vld [vmem:[%s837_s3 + $0x60] sm:$0xff]  ;;  %v395_v44 = vld [vmem:[%s837_s3 + $0x68] sm:$0xff] }
   0xf   :  { %82 = vperm.xlu0 %579, %v48_v19   ;;  %v396_v45 = vld [vmem:[%s837_s3 + $0x70] sm:$0xff]  ;;  %v397_v46 = vld [vmem:[%s837_s3 + $0x78] sm:$0xff] }
  0x12   :  { %87 = vperm.xlu1 %580, %v49_v20  }
  0x13   :  { %92 = vperm.xlu0 %579, %v50_v21  }
  0x14   :  { %563 = vmatmul.mubr.msk.bf16.gmra.mxu0 %vm180_vm0, %v587_v17  ;;  %571 = vmatmul.mubr.msk.bf16.gmra.mxu1 %vm180_vm0, %v588_v18 }
  0x16   :  { %97 = vperm.xlu1 %580, %v51_v22  }
  0x17   :  { %102 = vperm.xlu0 %579, %v52_v23  }
  0x1a   :  { %107 = vperm.xlu1 %580, %v53_v24  }
  0x1b   :  { %112 = vperm.xlu0 %579, %v54_v25  }
  0x1e   :  { %117 = vperm.xlu1 %580, %v55_v26  }
  0x1f   :  { %122 = vperm.xlu0 %579, %v56_v27  }
  0x22   :  { %127 = vperm.xlu1 %580, %v57_v28  }
  0x23   :  { %132 = vperm.xlu0 %579, %v58_v29  }
  0x26   :  { %137 = vperm.xlu1 %580, %v59_v30  }
  0x27   :  { %400 = vperm.xlu0 %579, %v382_v31  }
  0x2a   :  { %405 = vperm.xlu1 %580, %v383_v32  }
  0x2b   :  { %410 = vperm.xlu0 %579, %v384_v33  }
  0x2e   :  { %415 = vperm.xlu1 %580, %v385_v34  }
  0x2f   :  { %420 = vperm.xlu0 %579, %v386_v35  }
  0x32   :  { %425 = vperm.xlu1 %580, %v387_v36  }
  0x33   :  { %430 = vperm.xlu0 %579, %v388_v37  }
  0x36   :  { %435 = vperm.xlu1 %580, %v389_v38  }
  0x37   :  { %440 = vperm.xlu0 %579, %v390_v39  }
  0x3a   :  { %445 = vperm.xlu1 %580, %v391_v40  }
  0x3b   :  { %450 = vperm.xlu0 %579, %v392_v41  }
  0x3e   :  { %455 = vperm.xlu1 %580, %v393_v42  }
  0x3f   :  { %460 = vperm.xlu0 %579, %v394_v43  }
  0x42   :  { %465 = vperm.xlu1 %580, %v395_v44  }
  0x43   :  { %470 = vperm.xlu0 %579, %v396_v45  }
  0x46   :  { %475 = vperm.xlu1 %580, %v397_v46  }
  0x82   :  { %v63_v47 = vpop.permute.xlu0 %62 }
  0x83   :  { %v73_v48 = vpop.permute.xlu1 %72 }
  0x86   :  { %v68_v49 = vpop.permute.xlu0 %67 }
  0x89   :  { %v78_v50 = vpop.permute.xlu1 %77 }
  0x8a   :  { %v83_v51 = vpop.permute.xlu0 %82 }
  0x8d   :  { %v88_v52 = vpop.permute.xlu1 %87 }
  0x8e   :  { %v93_v53 = vpop.permute.xlu0 %92 }
  0x91   :  { %v98_v54 = vpop.permute.xlu1 %97 }
  0x92   :  { %v103_v57 = vpop.permute.xlu0 %102 }
  0x95   :  { %v108_v1 = vpop.permute.xlu1 %107 }
  0x96   :  { %v113_v7 = vpop.permute.xlu0 %112 }
  0x99   :  { %v118_v19 = vpop.permute.xlu1 %117 }
  0x9a   :  { %v123_v30 = vpop.permute.xlu0 %122 }
  0x9d   :  { %v128_v40 = vpop.permute.xlu1 %127 }
  0xcc   :  { %v560_v55 = vpop.f32.mrf.mxu0  ;;  %v568_v56 = vpop.f32.mrf.mxu1 }
  0xcd   :  { %v248_v58 = vadd.f32 %v560_v55, %v73_v48  ;;  %v280_v26 = vadd.f32 %v568_v56, %v113_v7  ;;  %v138_v56 = vpop.permute.xlu1 %137 }
  0xce   :  { %v239_v59 = vpop.f32.mrf.mxu0  ;;  %v271_v60 = vpop.f32.mrf.mxu1 }
  0xcf   :  { %v304_v61 = vsub.f32 0.0, %v248_v58  ;;  %v240_v62 = vadd.f32 %v239_v59, %v63_v47  ;;  %v272_v13 = vadd.f32 %v271_v60, %v103_v57  ;;  %v312_v41 = vsub.f32 0.0, %v280_v26 }
  0xd0   :  { %v561_v63 = vpop.f32.mrf.mxu0  ;;  %v569_v0 = vpop.f32.mrf.mxu1 }
  0xd1   :  { %v322_v2 = vmul.f32 1.442695, %v304_v61  ;;  %v302_v3 = vsub.f32 0.0, %v240_v62  ;;  %v251_v4 = vadd.f32 %v561_v63, %v78_v50  ;;  %v310_v27 = vsub.f32 0.0, %v272_v13 }
  0xd2   :  { %v242_v5 = vpop.f32.mrf.mxu0  ;;  %v274_v6 = vpop.f32.mrf.mxu1  ;;  %v283_v31 = vadd.f32 %v569_v0, %v118_v19 }
  0xd3   :  { %v318_v8 = vmul.f32 1.442695, %v302_v3  ;;  %v243_v9 = vadd.f32 %v242_v5, %v68_v49  ;;  %589 = vpow2.f32 %v322_v2  ;;  %v305_v10 = vsub.f32 0.0, %v251_v4  ;;  %v133_v49 = vpop.permute.xlu0 %132 }
  0xd4   :  { %v564_v11 = vpop.f32.mrf.mxu0  ;;  %v572_v12 = vpop.f32.mrf.mxu1  ;;  %v275_v23 = vadd.f32 %v274_v6, %v108_v1  ;;  %v334_v42 = vmul.f32 1.442695, %v310_v27  ;;  %v313_v44 = vsub.f32 0.0, %v283_v31 }
  0xd5   :  { %591 = vpow2.f32 %v318_v8  ;;  %v303_v14 = vsub.f32 0.0, %v243_v9  ;;  %v264_v15 = vadd.f32 %v564_v11, %v93_v53  ;;  %v324_v16 = vmul.f32 1.442695, %v305_v10  ;;  %v406_v6 = vpop.permute.xlu1 %405 }
  0xd6   :  { %v255_v17 = vpop.f32.mrf.mxu0  ;;  %v287_v18 = vpop.f32.mrf.mxu1  ;;  %v311_v37 = vsub.f32 0.0, %v275_v23  ;;  %v338_v53 = vmul.f32 1.442695, %v312_v41  ;;  %v340_v55 = vmul.f32 1.442695, %v313_v44 }
  0xd7   :  { %v320_v20 = vmul.f32 1.442695, %v303_v14  ;;  %v308_v21 = vsub.f32 0.0, %v264_v15  ;;  %v256_v22 = vadd.f32 %v255_v17, %v83_v51  ;;  %593 = vpow2.f32 %v324_v16  ;;  %v401_v1 = vpop.permute.xlu0 %400 }
  0xd8   :  { %v565_v24 = vpop.f32.mrf.mxu0  ;;  %v573_v25 = vpop.f32.mrf.mxu1  ;;  %v288_v35 = vadd.f32 %v287_v18, %v123_v30  ;;  %v336_v50 = vmul.f32 1.442695, %v311_v37 }
  0xd9   :  { %v330_v28 = vmul.f32 1.442695, %v308_v21  ;;  %v306_v29 = vsub.f32 0.0, %v256_v22  ;;  %595 = vpow2.f32 %v320_v20  ;;  %v267_v32 = vadd.f32 %v565_v24, %v98_v54  ;;  %v416_v17 = vpop.permute.xlu1 %415 }
  0xda   :  { %v258_v33 = vpop.f32.mrf.mxu0  ;;  %v290_v39 = vpop.f32.mrf.mxu1  ;;  %v314_v46 = vsub.f32 0.0, %v288_v35  ;;  %v299_v60 = vadd.f32 %v573_v25, %v138_v56 }
  0xdb   :  { %v326_v34 = vmul.f32 1.442695, %v306_v29  ;;  %v259_v36 = vadd.f32 %v258_v33, %v88_v52  ;;  %v309_v38 = vsub.f32 0.0, %v267_v32  ;;  %597 = vpow2.f32 %v330_v28  ;;  %v411_v13 = vpop.permute.xlu0 %410 }
  0xdc   :  { %v291_v48 = vadd.f32 %v290_v39, %v128_v40  ;;  %v296_v52 = vadd.f32 %v572_v12, %v133_v49  ;;  %v342_v57 = vmul.f32 1.442695, %v314_v46  ;;  %v317_v5 = vsub.f32 0.0, %v299_v60 }
  0xdd   :  { %v307_v43 = vsub.f32 0.0, %v259_v36  ;;  %599 = vpow2.f32 %v326_v34  ;;  %v332_v45 = vmul.f32 1.442695, %v309_v38  ;;  %v426_v28 = vpop.permute.xlu1 %425 }
  0xde   :  { %v315_v58 = vsub.f32 0.0, %v291_v48  ;;  %v316_v63 = vsub.f32 0.0, %v296_v52  ;;  %v348_v11 = vmul.f32 1.442695, %v317_v5 }
  0xdf   :  { %v328_v47 = vmul.f32 1.442695, %v307_v43  ;;  %601 = vpow2.f32 %v332_v45  ;;  %v421_v24 = vpop.permute.xlu0 %420 }
  0xe0   :  { %v590_v51 = vpop.eup %589  ;;  %603 = vpow2.f32 %v334_v42  ;;  %v344_v2 = vmul.f32 1.442695, %v315_v58  ;;  %v346_v7 = vmul.f32 1.442695, %v316_v63 }
  0xe1   :  { %605 = vpow2.f32 %v328_v47  ;;  %v352_v62 = vadd.f32 1.0, %v590_v51  ;;  %v436_v43 = vpop.permute.xlu1 %435 }
  0xe2   :  { %v592_v54 = vpop.eup %591  ;;  %607 = vpow2.f32 %v336_v50 }
  0xe3   :  { %v350_v59 = vadd.f32 1.0, %v592_v54  ;;  %609 = vpow2.f32 %v338_v53  ;;  %v431_v37 = vpop.permute.xlu0 %430 }
  0xe4   :  { %v594_v61 = vpop.eup %593  ;;  %611 = vpow2.f32 %v340_v55 }
  0xe5   :  { %613 = vpow2.f32 %v342_v57  ;;  %v353_v3 = vadd.f32 1.0, %v594_v61  ;;  %v446_v58 = vpop.permute.xlu1 %445 }
  0xe6   :  { %v596_v0 = vpop.eup %595  ;;  %615 = vrcp.f32 %v350_v59 }
  0xe7   :  { %v351_v4 = vadd.f32 1.0, %v596_v0  ;;  %617 = vrcp.f32 %v352_v62  ;;  %v441_v52 = vpop.permute.xlu0 %440 }
  0xe8   :  { %v598_v8 = vpop.eup %597 }
  0xe9   :  { %619 = vrcp.f32 %v351_v4  ;;  %v356_v14 = vadd.f32 1.0, %v598_v8  ;;  %v456_v5 = vpop.permute.xlu1 %455 }
  0xea   :  { %v600_v9 = vpop.eup %599  ;;  %621 = vpow2.f32 %v344_v2 }
  0xeb   :  { %623 = vrcp.f32 %v353_v3  ;;  %v354_v10 = vadd.f32 1.0, %v600_v9 }
  0xec   :  { %v602_v12 = vpop.eup %601  ;;  %625 = vpow2.f32 %v346_v7 }
  0xed   :  { %v604_v15 = vpop.eup %603  ;;  %627 = vrcp.f32 %v354_v10  ;;  %v357_v18 = vadd.f32 1.0, %v602_v12 }
  0xee   :  { %v606_v16 = vpop.eup %605  ;;  %629 = vpow2.f32 %v348_v11  ;;  %v358_v22 = vadd.f32 1.0, %v604_v15 }
  0xef   :  { %v355_v19 = vadd.f32 1.0, %v606_v16  ;;  %v608_v20 = vpop.eup %607  ;;  %631 = vrcp.f32 %v356_v14  ;;  %v466_v16 = vpop.permute.xlu1 %465 }
  0xf0   :  { %v610_v21 = vpop.eup %609  ;;  %v359_v26 = vadd.f32 1.0, %v608_v20 }
  0xf1   :  { %633 = vrcp.f32 %v355_v19  ;;  %v612_v23 = vpop.eup %611  ;;  %v360_v30 = vadd.f32 1.0, %v610_v21 }
  0xf2   :  { %v614_v25 = vpop.eup %613  ;;  %635 = vrcp.f32 %v357_v18  ;;  %v361_v34 = vadd.f32 1.0, %v612_v23 }
  0xf3   :  { %v616_v27 = vpop.eup %615  ;;  %637 = vrcp.f32 %v358_v22  ;;  %v362_v41 = vadd.f32 1.0, %v614_v25 }
  0xf4   :  { %v618_v29 = vpop.eup %617  ;;  %v478_v33 = vmul.f32 %v616_v27, %v401_v1  ;;  %639 = vrcp.f32 %v359_v26  ;;  %v451_v1 = vpop.permute.xlu0 %450 }
  0xf5   :  { %v480_v39 = vmul.f32 %v618_v29, %v411_v13  ;;  %641 = vrcp.f32 %v360_v30  ;;  %v476_v26 = vpop.permute.xlu1 %475 }
  0xf6   :  { %v620_v31 = vpop.eup %619  ;;  %643 = vrcp.f32 %v361_v34 }
  0xf7   :  { %v622_v32 = vpop.eup %621  ;;  %v479_v35 = vmul.f32 %v620_v31, %v406_v6  ;;  %645 = vrcp.f32 %v362_v41 }
  0xf8   :  { %v624_v36 = vpop.eup %623  ;;  %v363_v46 = vadd.f32 1.0, %v622_v32  ;;  %v461_v12 = vpop.permute.xlu0 %460 }
  0xf9   :  { %v626_v38 = vpop.eup %625  ;;  %v494_v40 = vadd.f32 %v479_v35, %v478_v33  ;;  %v481_v44 = vmul.f32 %v624_v36, %v416_v17  ;;  %v516_v35 = vstv %s838_s4 }
  0xfa   :  { %v628_v42 = vpop.eup %627  ;;  %v364_v49 = vadd.f32 1.0, %v626_v38  ;;  %647 = vrcp.f32 %v363_v46 }
  0xfb   :  { %v495_v45 = vadd.f32 %v494_v40, %v480_v39  ;;  %v630_v47 = vpop.eup %629  ;;  %v482_v50 = vmul.f32 %v628_v42, %v421_v24 }
  0xfc   :  { %v632_v48 = vpop.eup %631  ;;  %v365_v55 = vadd.f32 1.0, %v630_v47  ;;  %649 = vrcp.f32 %v364_v49  ;;  %v471_v23 = vpop.permute.xlu0 %470 }
  0xfd   :  { %v496_v51 = vadd.f32 %v495_v45, %v481_v44  ;;  %v484_v59 = vmul.f32 %v632_v48, %v431_v37 }
  0xfe   :  { %v634_v53 = vpop.eup %633  ;;  %651 = vrcp.f32 %v365_v55 }
  0xff   :  { %v497_v54 = vadd.f32 %v496_v51, %v482_v50  ;;  %v483_v56 = vmul.f32 %v634_v53, %v426_v28  ;;  %v636_v57 = vpop.eup %635 }
 0x100   :  { %v638_v61 = vpop.eup %637  ;;  %v485_v62 = vmul.f32 %v636_v57, %v436_v43 }
 0x101   :  { %v498_v60 = vadd.f32 %v497_v54, %v483_v56  ;;  %v640_v0 = vpop.eup %639  ;;  %v486_v2 = vmul.f32 %v638_v61, %v441_v52 }
 0x102   :  { %v642_v4 = vpop.eup %641  ;;  %v487_v6 = vmul.f32 %v640_v0, %v446_v58 }
 0x103   :  { %v499_v63 = vadd.f32 %v498_v60, %v484_v59  ;;  %v644_v8 = vpop.eup %643  ;;  %v488_v9 = vmul.f32 %v642_v4, %v451_v1 }
 0x104   :  { %v646_v11 = vpop.eup %645  ;;  %v489_v13 = vmul.f32 %v644_v8, %v456_v5 }
 0x105   :  { %v500_v3 = vadd.f32 %v499_v63, %v485_v62  ;;  %v490_v17 = vmul.f32 %v646_v11, %v461_v12 }
 0x107   :  { %v501_v7 = vadd.f32 %v500_v3, %v486_v2  ;;  %v648_v15 = vpop.eup %647 }
 0x108   :  { %v491_v20 = vmul.f32 %v648_v15, %v466_v16 }
 0x109   :  { %v502_v10 = vadd.f32 %v501_v7, %v487_v6  ;;  %v650_v19 = vpop.eup %649 }
 0x10a   :  { %v492_v24 = vmul.f32 %v650_v19, %v471_v23 }
 0x10b   :  { %v503_v14 = vadd.f32 %v502_v10, %v488_v9  ;;  %v652_v22 = vpop.eup %651 }
 0x10c   :  { %v493_v27 = vmul.f32 %v652_v22, %v476_v26 }
 0x10d   :  { %v504_v18 = vadd.f32 %v503_v14, %v489_v13 }
 0x10f   :  { %v505_v21 = vadd.f32 %v504_v18, %v490_v17 }
 0x111   :  { %v506_v25 = vadd.f32 %v505_v21, %v491_v20 }
 0x113   :  { %v507_v28 = vadd.f32 %v506_v25, %v492_v24 }
 0x115   :  { %v508_v29 = vadd.f32 %v507_v28, %v493_v27 }
 0x117   :  { %v509_v30 = vrot.slane %v508_v29, 4 }
 0x119   :  { %v510_v31 = vadd.f32 %v509_v30, %v508_v29 }
 0x11b   :  { %v511_v32 = vrot.slane %v510_v31, 2 }
 0x11d   :  { %v512_v33 = vadd.f32 %v511_v32, %v510_v31 }
 0x11f   :  { %v513_v34 = vrot.slane %v512_v33, 1 }
 0x121   :  { %v514_v36 = vadd.f32 %v513_v34, %v512_v33 }
 0x123   :  { %v517_v37 = vadd.f32 %v516_v35, %v514_v36 }
 0x125   :  { %v518_v38 = vsub.f32 0.0, %v517_v37 }
 0x127   :  { %v519_v39 = vmul.f32 1.442695, %v518_v38 }
 0x129   :  { %653 = vpow2.f32 %v519_v39 }
 0x136   :  { %v654_v40 = vpop.eup %653 }
 0x137   :  { %v521_v41 = vadd.f32 1.0, %v654_v40 }
 0x139   :  { %655 = vrcp.f32 %v521_v41 }
 0x146   :  { %v656_v42 = vpop.eup %655 }
 0x147   :  { %523 = vst [vmem:[%s839_s5] sm:$0x1] %v656_v42 }

</bundles_post_ra>
